<compile_context>
chip_gen: v6e
topology: v6e:2x2x1
jax: 0.10.0
libtpu: 0.0.40
codegen_flags: <defaults>
</compile_context>

<pallas_src>
import jax
import jax.numpy as jnp
from jax.experimental import pallas as pl
from jax.experimental.pallas import tpu as pltpu


# ----------------------------- fused FFN kernel ------------------------------

def _ffn_kernel(x_ref, w1_ref, b1_ref, w2_ref, b2_ref, o_ref, acc_ref):
    """One (row-tile, hidden-tile) grid step of  gelu(x@w1+b1) @ w2 + b2."""
    h_idx = pl.program_id(1)

    @pl.when(h_idx == 0)
    def _():
        # Fold the second bias into the accumulator init (saves an epilogue VPU pass).
        acc_ref[...] = jnp.broadcast_to(
            b2_ref[...].astype(jnp.float32), acc_ref.shape)

    # First matmul in native storage dtype (bf16 hits the full MXU rate); f32 accumulate.
    h = jnp.dot(x_ref[...], w1_ref[...], preferred_element_type=jnp.float32)
    h = h + b1_ref[...].astype(jnp.float32)

    # Exact (erf) GELU, matching torch.nn.GELU() default.
    h = 0.5 * h * (1.0 + jax.lax.erf(h * 0.7071067811865476))

    # Cast hidden activation back to the weight dtype for the second MXU pass.
    acc_ref[...] += jnp.dot(h.astype(w2_ref.dtype), w2_ref[...],
                            preferred_element_type=jnp.float32)

    @pl.when(h_idx == pl.num_programs(1) - 1)
    def _():
        o_ref[...] = acc_ref[...].astype(o_ref.dtype)


# ------------------------------ wrapper ---------------------------------------

def _round_up(x, m):
    return (x + m - 1) // m * m


def _cdiv(a, b):
    return (a + b - 1) // b


def _vmem_bytes(tm, th, dim_p, itemsize):
    # Double-buffered streamed tiles (x, w1, b1, w2, b2, out) + resident f32 accumulator.
    stream = tm * dim_p + dim_p * th + th + th * dim_p + dim_p + tm * dim_p
    return 2 * itemsize * stream + 4 * tm * dim_p


def pallas_feedforward(x, w1, b1, w2, b2, *, row_tile=512, hidden_tile=512):
    """Fused FeedForward: gelu(x @ w1 + b1) @ w2 + b2.

    x : [..., dim]       w1 : [dim, hidden]   b1 : [hidden]
    w2 : [hidden, dim]   b2 : [dim]
    Dropout in the reference module has p=0.0 -> identity (not emitted).
    """
    orig_shape = x.shape
    dim = orig_shape[-1]
    hidden = w1.shape[1]

    x2 = x.reshape(-1, dim)
    m = x2.shape[0]
    item = jnp.dtype(x.dtype).itemsize

    # Lane-dense feature padding; 256-multiples feed the 2x(256x256) MXU fully.
    dim_p = _round_up(dim, 256 if dim > 128 else 128)

    # Row tile: multiple of 16 for sub-32-bit dtypes (2 rows/sublane packing), else 8.
    row_mult = 16 if item < 4 else 8
    tm = min(row_tile, _round_up(m, row_mult))
    # v7x megacore: make the "parallel" row axis at least 2 tiles when rows allow.
    if _cdiv(m, tm) < 2 and m >= 2 * row_mult:
        tm = _round_up(_cdiv(m, 2), row_mult)

    # Hidden (reduction) tile, multiple of 128.
    th = max(128, (min(hidden_tile, _round_up(hidden, 128)) // 128) * 128)

    # Fit double-buffered streams + f32 accumulator in a conservative VMEM budget
    # (safe on v5e/v7x scoped limits while leaving v6e headroom).
    budget = 36 * 2**20
    while _vmem_bytes(tm, th, dim_p, item) > budget and th > 128:
        th = max(128, ((th // 2) // 128) * 128)
    while _vmem_bytes(tm, th, dim_p, item) > budget and tm > row_mult:
        tm = max(row_mult, _round_up(tm // 2, row_mult))

    m_p = _round_up(m, tm)
    hidden_p = _round_up(hidden, th)

    # Pad only when required (fast path for tile-aligned transformer shapes skips all copies).
    xp = x2 if (m_p, dim_p) == (m, dim) else (
        jnp.zeros((m_p, dim_p), x.dtype).at[:m, :dim].set(x2))
    w1p = w1 if (dim_p, hidden_p) == (dim, hidden) else (
        jnp.zeros((dim_p, hidden_p), w1.dtype).at[:dim, :hidden].set(w1))
    w2p = w2 if (hidden_p, dim_p) == (hidden, dim) else (
        jnp.zeros((hidden_p, dim_p), w2.dtype).at[:hidden, :dim].set(w2))
    b1p = (b1.reshape(1, hidden) if hidden_p == hidden else
           jnp.zeros((1, hidden_p), b1.dtype).at[0, :hidden].set(b1))
    b2p = (b2.reshape(1, dim) if dim_p == dim else
           jnp.zeros((1, dim_p), b2.dtype).at[0, :dim].set(b2))

    grid = (m_p // tm, hidden_p // th)

    vmem_limit = int(min(64 * 2**20,
                         max(32 * 2**20, int(_vmem_bytes(tm, th, dim_p, item) * 1.5))))

    out = pl.pallas_call(
        _ffn_kernel,
        out_shape=jax.ShapeDtypeStruct((m_p, dim_p), x.dtype),
        grid_spec=pltpu.PrefetchScalarGridSpec(
            num_scalar_prefetch=0,
            grid=grid,
            in_specs=[
                pl.BlockSpec((tm, dim_p), lambda mi, hi: (mi, 0)),      # x rows (resident over hi)
                pl.BlockSpec((dim_p, th), lambda mi, hi: (0, hi)),      # w1 hidden-tile cols
                pl.BlockSpec((1, th),     lambda mi, hi: (0, hi)),      # b1 slice
                pl.BlockSpec((th, dim_p), lambda mi, hi: (hi, 0)),      # w2 hidden-tile rows
                pl.BlockSpec((1, dim_p),  lambda mi, hi: (0, 0)),       # b2
            ],
            out_specs=pl.BlockSpec((tm, dim_p), lambda mi, hi: (mi, 0)),
            scratch_shapes=[pltpu.VMEM((tm, dim_p), jnp.float32)],
        ),
        compiler_params=pltpu.CompilerParams(
            dimension_semantics=("parallel", "arbitrary"),
            vmem_limit_bytes=vmem_limit,
        ),
    )(xp, w1p, b1p, w2p, b2p)

    if (m_p, dim_p) != (m, dim):
        out = out[:m, :dim]
    return out.reshape(orig_shape)


# ------------------------------ reference ------------------------------------

def reference_feedforward(x, w1, b1, w2, b2):
    x32 = x.astype(jnp.float32)
    h = jnp.dot(x32, w1.astype(jnp.float32)) + b1.astype(jnp.float32)
    h = jax.nn.gelu(h, approximate=False)
    return jnp.dot(h, w2.astype(jnp.float32)) + b2.astype(jnp.float32)


# --------------------------------- main ---------------------------------------

if __name__ == "__main__":
    key = jax.random.PRNGKey(0)

    def make_case(key, batch_shape, dim, hidden, dtype):
        k = jax.random.split(key, 5)
        x = jax.random.normal(k[0], (*batch_shape, dim), jnp.float32).astype(dtype)
        w1 = (0.02 * jax.random.normal(k[1], (dim, hidden), jnp.float32)).astype(dtype)
        b1 = (0.02 * jax.random.normal(k[2], (hidden,), jnp.float32)).astype(dtype)
        w2 = (0.02 * jax.random.normal(k[3], (hidden, dim), jnp.float32)).astype(dtype)
        b2 = (0.02 * jax.random.normal(k[4], (dim,), jnp.float32)).astype(dtype)
        return x, w1, b1, w2, b2

    fwd = jax.jit(pallas_feedforward)
    k1, k2, k3 = jax.random.split(key, 3)

    # Case 1: small ViT-ish token tensor [batch=2, seq=8, dim=32], hidden=64, f32
    # (exercises the padded path and a 2-tile parallel row axis).
    x, w1, b1, w2, b2 = make_case(k1, (2, 8), 32, 64, jnp.float32)
    out = fwd(x, w1, b1, w2, b2)
    jax.block_until_ready(out)
    ref = reference_feedforward(x, w1, b1, w2, b2)
    assert out.shape == x.shape, (out.shape, x.shape)
    err = float(jnp.max(jnp.abs(out.astype(jnp.float32) - ref)))
    assert err < 2e-4, err

    # Case 2: bf16, tile-aligned fast path (no padding copies), multi-tile grid with
    # a 2-step hidden reduction: rows=128, dim=256, hidden=1024.
    x, w1, b1, w2, b2 = make_case(k2, (128,), 256, 1024, jnp.bfloat16)
    out = fwd(x, w1, b1, w2, b2)
    jax.block_until_ready(out)
    ref = reference_feedforward(x, w1, b1, w2, b2)
    assert out.shape == x.shape, (out.shape, x.shape)
    assert jnp.allclose(out.astype(jnp.float32), ref, atol=1e-2, rtol=5e-2), \
        float(jnp.max(jnp.abs(out.astype(jnp.float32) - ref)))
    assert jnp.all(jnp.isfinite(out.astype(jnp.float32)))

    # Case 3: odd, unaligned sizes exercising every padding branch: [2, 7, 48], hidden=100.
    x, w1, b1, w2, b2 = make_case(k3, (2, 7), 48, 100, jnp.float32)
    out = fwd(x, w1, b1, w2, b2)
    jax.block_until_ready(out)
    ref = reference_feedforward(x, w1, b1, w2, b2)
    assert out.shape == x.shape, (out.shape, x.shape)
    err = float(jnp.max(jnp.abs(out.astype(jnp.float32) - ref)))
    assert err < 2e-4, err

    print("KERNEL_OK")
</pallas_src>

<mosaic_0001>
module attributes {stable_mosaic.version = 11 : i64} {
  func.func @_ffn_kernel(%arg0: i32, %arg1: i32, %arg2: memref<8x128xf32, #tpu.memory_space<vmem>>, %arg3: memref<128x128xf32, #tpu.memory_space<vmem>>, %arg4: memref<1x128xf32, #tpu.memory_space<vmem>>, %arg5: memref<128x128xf32, #tpu.memory_space<vmem>>, %arg6: memref<1x128xf32, #tpu.memory_space<vmem>>, %arg7: memref<8x128xf32, #tpu.memory_space<vmem>>, %arg8: memref<8x128xf32, #tpu.memory_space<vmem>>) attributes {dimension_semantics = [#tpu.dimension_semantics<parallel>, #tpu.dimension_semantics<arbitrary>], iteration_bounds = array<i64: 2, 1>, scalar_prefetch = 0 : i64, scratch_operands = 1 : i64, tpu.core_type = #tpu.core_type<tc>, window_params = [{transform_indices = @transform_0, window_bounds = array<i64: 8, 128>}, {transform_indices = @transform_1, window_bounds = array<i64: 128, 128>}, {transform_indices = @transform_2, window_bounds = array<i64: 1, 128>}, {transform_indices = @transform_3, window_bounds = array<i64: 128, 128>}, {pipeline_mode = #tpu.pipeline_mode<synchronous>, transform_indices = @transform_4, window_bounds = array<i64: 1, 128>}, {transform_indices = @transform_5, window_bounds = array<i64: 8, 128>}]} {
    %c0_i32 = arith.constant 0 : i32
    %0 = arith.cmpi eq, %arg1, %c0_i32 : i32
    %1 = arith.extui %0 : i1 to i32
    %c0_i32_0 = arith.constant 0 : i32
    %2 = arith.cmpi ne, %1, %c0_i32_0 : i32
    scf.if %2 {
      %c0_18 = arith.constant 0 : index
      %c0_19 = arith.constant 0 : index
      %25 = vector.load %arg6[%c0_18, %c0_19] : memref<1x128xf32, #tpu.memory_space<vmem>>, vector<1x128xf32>
      %26 = vector.shape_cast %25 : vector<1x128xf32> to vector<1x128xf32>
      %27 = vector.broadcast %26 : vector<1x128xf32> to vector<8x128xf32>
      %c0_20 = arith.constant 0 : index
      %c0_21 = arith.constant 0 : index
      %28 = vector.load %arg8[%c0_20, %c0_21] : memref<8x128xf32, #tpu.memory_space<vmem>>, vector<8x128xf32>
      tpu.vector_store %arg8[%c0_20, %c0_21], %27 {strides = array<i32>} : memref<8x128xf32, #tpu.memory_space<vmem>>, vector<8x128xf32>,
    } else {
    }
    %c0 = arith.constant 0 : index
    %c0_1 = arith.constant 0 : index
    %3 = vector.load %arg2[%c0, %c0_1] : memref<8x128xf32, #tpu.memory_space<vmem>>, vector<8x128xf32>
    %c0_2 = arith.constant 0 : index
    %c0_3 = arith.constant 0 : index
    %4 = vector.load %arg3[%c0_2, %c0_3] : memref<128x128xf32, #tpu.memory_space<vmem>>, vector<128x128xf32>
    %cst = arith.constant dense<0.000000e+00> : vector<8x128xf32>
    %5 = tpu.matmul %3, %4, %cst {dimension_numbers = #tpu.dot_dimension_numbers<[1], [0], [0], [1], [0, 0, 1, 1], [], []>} : vector<8x128xf32>, vector<128x128xf32>, vector<8x128xf32> -> vector<8x128xf32>
    %c0_4 = arith.constant 0 : index
    %c0_5 = arith.constant 0 : index
    %6 = vector.load %arg4[%c0_4, %c0_5] : memref<1x128xf32, #tpu.memory_space<vmem>>, vector<1x128xf32>
    %7 = vector.broadcast %6 : vector<1x128xf32> to vector<8x128xf32>
    %8 = arith.addf %5, %7 : vector<8x128xf32>
    %cst_6 = arith.constant 5.000000e-01 : f32
    %9 = vector.broadcast %cst_6 : f32 to vector<8x128xf32>
    %10 = arith.mulf %9, %8 : vector<8x128xf32>
    %cst_7 = arith.constant 0.707106769 : f32
    %11 = vector.broadcast %cst_7 : f32 to vector<8x128xf32>
    %12 = arith.mulf %8, %11 : vector<8x128xf32>
    %13 = math.erf %12 : vector<8x128xf32>
    %cst_8 = arith.constant 1.000000e+00 : f32
    %14 = vector.broadcast %cst_8 : f32 to vector<8x128xf32>
    %15 = arith.addf %14, %13 : vector<8x128xf32>
    %16 = arith.mulf %10, %15 : vector<8x128xf32>
    %c0_9 = arith.constant 0 : index
    %c0_10 = arith.constant 0 : index
    %17 = vector.load %arg8[%c0_9, %c0_10] : memref<8x128xf32, #tpu.memory_space<vmem>>, vector<8x128xf32>
    %c0_11 = arith.constant 0 : index
    %c0_12 = arith.constant 0 : index
    %18 = vector.load %arg5[%c0_11, %c0_12] : memref<128x128xf32, #tpu.memory_space<vmem>>, vector<128x128xf32>
    %cst_13 = arith.constant dense<0.000000e+00> : vector<8x128xf32>
    %19 = tpu.matmul %16, %18, %cst_13 {dimension_numbers = #tpu.dot_dimension_numbers<[1], [0], [0], [1], [0, 0, 1, 1], [], []>} : vector<8x128xf32>, vector<128x128xf32>, vector<8x128xf32> -> vector<8x128xf32>
    %20 = arith.addf %17, %19 : vector<8x128xf32>
    %c0_14 = arith.constant 0 : index
    %c0_15 = arith.constant 0 : index
    %21 = vector.load %arg8[%c0_14, %c0_15] : memref<8x128xf32, #tpu.memory_space<vmem>>, vector<8x128xf32>
    tpu.vector_store %arg8[%c0_14, %c0_15], %20 {strides = array<i32>} : memref<8x128xf32, #tpu.memory_space<vmem>>, vector<8x128xf32>,
    %c0_i32_16 = arith.constant 0 : i32
    %22 = arith.cmpi eq, %arg1, %c0_i32_16 : i32
    %23 = arith.extui %22 : i1 to i32
    %c0_i32_17 = arith.constant 0 : i32
    %24 = arith.cmpi ne, %23, %c0_i32_17 : i32
    scf.if %24 {
      %c0_18 = arith.constant 0 : index
      %c0_19 = arith.constant 0 : index
      %25 = vector.load %arg8[%c0_18, %c0_19] : memref<8x128xf32, #tpu.memory_space<vmem>>, vector<8x128xf32>
      %c0_20 = arith.constant 0 : index
      %c0_21 = arith.constant 0 : index
      %26 = vector.load %arg7[%c0_20, %c0_21] : memref<8x128xf32, #tpu.memory_space<vmem>>, vector<8x128xf32>
      tpu.vector_store %arg7[%c0_20, %c0_21], %25 {strides = array<i32>} : memref<8x128xf32, #tpu.memory_space<vmem>>, vector<8x128xf32>,
    } else {
    }
    return
  }
  func.func @transform_0(%arg0: i32, %arg1: i32) -> (i32, i32) {
    %c0_i32 = arith.constant 0 : i32
    %c0_i32_0 = arith.constant 0 : i32
    return %arg0, %c0_i32 : i32, i32
  }
  func.func @transform_1(%arg0: i32, %arg1: i32) -> (i32, i32) {
    %c0_i32 = arith.constant 0 : i32
    %c0_i32_0 = arith.constant 0 : i32
    return %c0_i32, %arg1 : i32, i32
  }
  func.func @transform_2(%arg0: i32, %arg1: i32) -> (i32, i32) {
    %c0_i32 = arith.constant 0 : i32
    %c0_i32_0 = arith.constant 0 : i32
    return %c0_i32, %arg1 : i32, i32
  }
  func.func @transform_3(%arg0: i32, %arg1: i32) -> (i32, i32) {
    %c0_i32 = arith.constant 0 : i32
    %c0_i32_0 = arith.constant 0 : i32
    return %arg1, %c0_i32 : i32, i32
  }
  func.func @transform_4(%arg0: i32, %arg1: i32) -> (i32, i32) {
    %c0_i32 = arith.constant 0 : i32
    %c0_i32_0 = arith.constant 0 : i32
    %c0_i32_1 = arith.constant 0 : i32
    return %c0_i32, %c0_i32_0 : i32, i32
  }
  func.func @transform_5(%arg0: i32, %arg1: i32) -> (i32, i32) {
    %c0_i32 = arith.constant 0 : i32
    %c0_i32_0 = arith.constant 0 : i32
    return %arg0, %c0_i32 : i32, i32
  }
}

</mosaic_0001>

<bundles_post_ra>
// kernel: pallas_feedforward.1
= control target key start
LH: loop header
LB: loop body
LE: loop exit
PB: predicated region body
PF: predicated region fallthrough
CT: control target
= control target key end

     0   :  { %s796_s18 = smov 0   ;;  %s798_s19 = smov 0   ;;  %s976_s0 = inlined_call_operand.vmem [shape: f32[16,128], index: 0, kind: input, shape index: {}]   ;;  %s977_s1 = inlined_call_operand.vmem [shape: f32[128,128], index: 1, kind: input, shape index: {}]   ;;  %s978_s2 = inlined_call_operand.vmem [shape: f32[1,128], index: 2, kind: input, shape index: {}]   ;;  %s979_s3 = inlined_call_operand.vmem [shape: f32[128,128], index: 3, kind: input, shape index: {}]   ;;  %s980_s4 = inlined_call_operand.vmem [shape: f32[1,128], index: 4, kind: input, shape index: {}]   ;;  %s981_s5 = inlined_call_operand.vmem [shape: f32[16,128], index: 5, kind: output, shape index: {}]  }
   0x1   :  { %s800_s20 = smov 0  }
   0x2 LB: > { %s27_s21 = sadd.s32 1, %s758_s19  ;;  %p601_p0 = scmp.ge.s32.totalorder %s762_s20, 1  ;;  %s762_s20 = sphi %s800_s20, %s15_s20   ;;  %s758_s19 = sphi %s798_s19, %s983_s19   ;;  %s754_s18 = sphi %s796_s18, %s982_s18  }
   0x3   : > { %p29_p1 = scmp.ge.s32.totalorder %s27_s21, 2  ;;  %p226_p2 = scmp.lt.s32.totalorder %s762_s20, 3 }
   0x5   : > { %s985_s21 = smov (%p29_p1, %s27_s21), 0  ;;  %p227_p3 = pnand %p601_p0, %p226_p2 }
   0x6   : > { %p264_p4 = scmp.lt.s32.totalorder (!%p227_p3), %s754_s18, 1 }
   0x7   : > { %230 = sbr.rel (%p227_p3) target bundleno = 456 (0x1c8), region = 40 }
   0xc   : > { %v313_v0 = vld [vmem:[%s977_s1 + $0x78] sm:$0xff]  ;;  %v764_v1 = vmov 0.0   ;;  %v312_v2 = vld [vmem:[%s977_s1 + $0x70] sm:$0xff]  ;;  %vm765_vm0 = vmmov 0   ;;  %v311_v3 = vld [vmem:[%s977_s1 + $0x68] sm:$0xff]  ;;  %s987_s18 = smov (!%p264_p4, %s754_s18), 1 }
   0xd   : > { %642 = vmatprep.subr.mxu0 %v764_v1  ;;  %674 = vmatprep.mubr.msk.f32.mxu0 %vm765_vm0, %v764_v1  ;;  %v310_v4 = vld [vmem:[%s977_s1 + $0x60] sm:$0xff]  ;;  %v412_v5 = vld [vmem:[%s979_s3 + $0x78] sm:$0xff]  ;;  %v411_v6 = vld [vmem:[%s979_s3 + $0x70] sm:$0xff]  ;;  %s602_s10 = sshll.u32 %s987_s18, 3 }
   0xe   : > { %643 = vmatpush3.msra.mxu0 %v313_v0  ;;  %677 = vmatprep.subr.mxu1 %v764_v1  ;;  %v309_v7 = vld [vmem:[%s977_s1 + $0x58] sm:$0xff]  ;;  %v410_v8 = vld [vmem:[%s979_s3 + $0x68] sm:$0xff]  ;;  %v308_v9 = vld [vmem:[%s977_s1 + $0x50] sm:$0xff]  ;;  %s267_s17 = scalar_lea.vmem %s976_s0, %s602_s10  ;;  %s284_s9 = scalar_lea.vmem %s981_s5, %s602_s10 }
   0xf   : > { %644 = vmatprep.subr.mxu0 %v764_v1  ;;  %709 = vmatprep.mubr.msk.f32.mxu1 %vm765_vm0, %v764_v1  ;;  %v409_v10 = vld [vmem:[%s979_s3 + $0x60] sm:$0xff]  ;;  %v307_v11 = vld [vmem:[%s977_s1 + $0x48] sm:$0xff]  ;;  %v305_v13 = vld [vmem:[%s977_s1 + $0x38] sm:$0xff] }
  0x10   : > { %645 = vmatpush3.msra.mxu0 %v312_v2  ;;  %678 = vmatpush3.msra.mxu1 %v412_v5  ;;  %v306_v12 = vld [vmem:[%s977_s1 + $0x40] sm:$0xff]  ;;  %v304_v14 = vld [vmem:[%s977_s1 + $0x30] sm:$0xff]  ;;  %v303_v15 = vld [vmem:[%s977_s1 + $0x28] sm:$0xff] }
  0x11   : > { %646 = vmatprep.subr.mxu0 %v764_v1  ;;  %679 = vmatprep.subr.mxu1 %v764_v1  ;;  %v302_v16 = vld [vmem:[%s977_s1 + $0x20] sm:$0xff]  ;;  %v301_v17 = vld [vmem:[%s977_s1 + $0x18] sm:$0xff]  ;;  %v300_v18 = vld [vmem:[%s977_s1 + $0x10] sm:$0xff] }
  0x12   : > { %647 = vmatpush3.msra.mxu0 %v311_v3  ;;  %680 = vmatpush3.msra.mxu1 %v411_v6  ;;  %v299_v19 = vld [vmem:[%s977_s1 + $0x8] sm:$0xff]  ;;  %v298_v20 = vld [vmem:[%s977_s1] sm:$0xff]  ;;  %v408_v22 = vld [vmem:[%s979_s3 + $0x58] sm:$0xff] }
  0x13   : > { %648 = vmatprep.subr.mxu0 %v764_v1  ;;  %681 = vmatprep.subr.mxu1 %v764_v1  ;;  %v297_v21 = vld [vmem:[%s267_s17] sm:$0xff]  ;;  %v407_v23 = vld [vmem:[%s979_s3 + $0x50] sm:$0xff]  ;;  %v406_v24 = vld [vmem:[%s979_s3 + $0x48] sm:$0xff] }
  0x14   : > { %649 = vmatpush3.msra.mxu0 %v310_v4  ;;  %682 = vmatpush3.msra.mxu1 %v410_v8  ;;  %v405_v25 = vld [vmem:[%s979_s3 + $0x40] sm:$0xff]  ;;  %v404_v26 = vld [vmem:[%s979_s3 + $0x38] sm:$0xff]  ;;  %v403_v27 = vld [vmem:[%s979_s3 + $0x30] sm:$0xff] }
  0x15   : > { %650 = vmatprep.subr.mxu0 %v764_v1  ;;  %683 = vmatprep.subr.mxu1 %v764_v1  ;;  %v402_v28 = vld [vmem:[%s979_s3 + $0x28] sm:$0xff]  ;;  %v401_v29 = vld [vmem:[%s979_s3 + $0x20] sm:$0xff]  ;;  %v400_v30 = vld [vmem:[%s979_s3 + $0x18] sm:$0xff] }
  0x16   : > { %651 = vmatpush3.msra.mxu0 %v309_v7  ;;  %684 = vmatpush3.msra.mxu1 %v409_v10  ;;  %v399_v31 = vld [vmem:[%s979_s3 + $0x10] sm:$0xff]  ;;  %v398_v32 = vld [vmem:[%s979_s3 + $0x8] sm:$0xff]  ;;  %v397_v33 = vld [vmem:[%s979_s3] sm:$0xff] }
  0x17   : > { %652 = vmatprep.subr.mxu0 %v764_v1  ;;  %685 = vmatprep.subr.mxu1 %v764_v1  ;;  %v605_v34 = vld [vmem:[%s978_s2] ss:$0 sm:$0xff] }
  0x18   : > { %653 = vmatpush3.msra.mxu0 %v308_v9  ;;  %686 = vmatpush3.msra.mxu1 %v408_v22  ;;  %v604_v43 = vld [vmem:[%s980_s4] ss:$0 sm:$0xff] }
  0x19   : > { %654 = vmatprep.subr.mxu0 %v764_v1  ;;  %687 = vmatprep.subr.mxu1 %v764_v1 }
  0x1a   : > { %655 = vmatpush3.msra.mxu0 %v307_v11  ;;  %688 = vmatpush3.msra.mxu1 %v407_v23 }
  0x1b   : > { %656 = vmatprep.subr.mxu0 %v764_v1  ;;  %689 = vmatprep.subr.mxu1 %v764_v1 }
  0x1c   : > { %657 = vmatpush3.msra.mxu0 %v306_v12  ;;  %690 = vmatpush3.msra.mxu1 %v406_v24 }
  0x1d   : > { %658 = vmatprep.subr.mxu0 %v764_v1  ;;  %691 = vmatprep.subr.mxu1 %v764_v1 }
  0x1e   : > { %659 = vmatpush3.msra.mxu0 %v305_v13  ;;  %692 = vmatpush3.msra.mxu1 %v405_v25 }
  0x1f   : > { %660 = vmatprep.subr.mxu0 %v764_v1  ;;  %693 = vmatprep.subr.mxu1 %v764_v1 }
  0x20   : > { %661 = vmatpush3.msra.mxu0 %v304_v14  ;;  %694 = vmatpush3.msra.mxu1 %v404_v26 }
  0x21   : > { %662 = vmatprep.subr.mxu0 %v764_v1  ;;  %695 = vmatprep.subr.mxu1 %v764_v1 }
  0x22   : > { %663 = vmatpush3.msra.mxu0 %v303_v15  ;;  %696 = vmatpush3.msra.mxu1 %v403_v27 }
  0x23   : > { %664 = vmatprep.subr.mxu0 %v764_v1  ;;  %697 = vmatprep.subr.mxu1 %v764_v1 }
  0x24   : > { %665 = vmatpush3.msra.mxu0 %v302_v16  ;;  %698 = vmatpush3.msra.mxu1 %v402_v28 }
  0x25   : > { %666 = vmatprep.subr.mxu0 %v764_v1  ;;  %699 = vmatprep.subr.mxu1 %v764_v1 }
  0x26   : > { %667 = vmatpush3.msra.mxu0 %v301_v17  ;;  %700 = vmatpush3.msra.mxu1 %v401_v29 }
  0x27   : > { %668 = vmatprep.subr.mxu0 %v764_v1  ;;  %701 = vmatprep.subr.mxu1 %v764_v1 }
  0x28   : > { %669 = vmatpush3.msra.mxu0 %v300_v18  ;;  %702 = vmatpush3.msra.mxu1 %v400_v30 }
  0x29   : > { %670 = vmatprep.subr.mxu0 %v764_v1  ;;  %703 = vmatprep.subr.mxu1 %v764_v1 }
  0x2a   : > { %671 = vmatpush3.msra.mxu0 %v299_v19  ;;  %704 = vmatpush3.msra.mxu1 %v399_v31 }
  0x2b   : > { %672 = vmatprep.subr.mxu0 %v764_v1  ;;  %705 = vmatprep.subr.mxu1 %v764_v1 }
  0x2c   : > { %673 = vmatpush3.msra.mxu0 %v298_v20  ;;  %706 = vmatpush3.msra.mxu1 %v398_v32 }
  0x2d   : > { %675 = vmatmul.mubr.f32.vlgmr.msra.gmra.mxu0 %v297_v21  ;;  %707 = vmatprep.subr.mxu1 %v764_v1 }
  0x2e   : > { %708 = vmatpush3.msra.mxu1 %v397_v33 }
  0xed   : > { %v387_v35 = vpop.f32.mrf.mxu0 }
  0xee   : > { %v388_v36 = vadd.f32 %v605_v34, %v387_v35 }
  0xef   : > { %v676_v37 = vpop.f32.mrf.mxu0 }
  0xf0   : > { %v392_v38 = vmul.f32 0.70710677, %v388_v36  ;;  %v391_v40 = vmul.f32 0.5, %v388_v36 }
  0xf2   : > { %738 = verf.f32 %v392_v38 }
  0xff   : > { %v739_v39 = vpop.eup %738 }
 0x100   : > { %v394_v41 = vadd.f32 1.0, %v739_v39 }
 0x102   : > { %v395_v42 = vmul.f32 %v394_v41, %v391_v40 }
 0x104   : > { %710 = vmatmul.mubr.f32.vlgmr.msra.gmra.mxu1 %v395_v42 }
 0x1c4   : > { %v479_v44 = vpop.f32.mrf.mxu1 }
 0x1c5   : > { %v483_v45 = vadd.f32 %v604_v43, %v479_v44 }
 0x1c6   : > { %v711_v46 = vpop.f32.mrf.mxu1 }
 0x1c7   : > { %489 = vst [vmem:[%s284_s9] sm:$0xff] %v483_v45 }
 0x1c8 PF: > { %s15_s20 = sadd.s32 1, %s762_s20   ;;  %s982_s18 = smov %s758_s19 }
 0x1c9   : > { %p12_p5 = scmp.ge.s32.totalorder %s15_s20, 4   ;;  %s983_s19 = smov %s985_s21 }
 0x1cb   :  { %14 = sbr.rel (!%p12_p5) target bundleno = 2 (0x2), region = 87 }

</bundles_post_ra>
